<compile_context>
chip_gen: v6e
topology: v6e:2x2x1
jax: 0.10.0
libtpu: 0.0.40
codegen_flags: <defaults>
</compile_context>

<pallas_src>
import math
import functools

import jax
import jax.numpy as jnp
from jax.experimental import pallas as pl
from jax.experimental.pallas import tpu as pltpu


def make_positional_encoding(d_model, max_len=5000, dtype=jnp.float32):
    """Builds the (max_len, 1, d_model) pe buffer, matching torch __init__."""
    position = jnp.arange(0, max_len, dtype=jnp.float32)[:, None]          # (L, 1)
    div_term = jnp.exp(
        jnp.arange(0, d_model, 2, dtype=jnp.float32) * (-math.log(10000.0) / d_model)
    )                                                                       # (D/2,)
    pe = jnp.zeros((max_len, d_model), dtype=jnp.float32)
    pe = pe.at[:, 0::2].set(jnp.sin(position * div_term))
    pe = pe.at[:, 1::2].set(jnp.cos(position * div_term))
    return pe[:, None, :].astype(dtype)                                     # (L, 1, D)


def _pe_eval_kernel(x_ref, pe_ref, o_ref):
    # x_ref: (ts, B, D), pe_ref: (ts, 1, D) -> broadcast add over batch.
    # pe is already in x.dtype (cast once in the wrapper).
    o_ref[...] = x_ref[...] + pe_ref[...]


def _pe_train_kernel(x_ref, pe_ref, bits_ref, o_ref, *, threshold, scale):
    # Fused positional-encoding add + inverted dropout.
    # Integer-threshold compare on raw uint32 bits, single fused select:
    #   keep  <=>  bits >= round(p * 2^32)      (P(keep) = 1 - p)
    y = x_ref[...] + pe_ref[...]
    keep = bits_ref[...] >= jnp.uint32(threshold)
    o_ref[...] = jnp.where(keep, y * scale, 0.0).astype(o_ref.dtype)


def _default_block_s(S, B, D, itemsize, target_bytes=2 << 20):
    """~2 MiB x-tiles, rounded to a multiple of 8 sequence rows.

    Double-buffered budget per grid step (train path, worst case):
      2*(x) + 2*(bits) + 2*(out) + 2*(pe)  ≈ 6 * 2 MiB + small  ≈ 12–13 MiB,
    which fits v5e's 16 MiB scoped default and leaves ample headroom on
    v6e (32 MiB scoped / 128 MiB) and v7x (64 MiB physical).
    """
    rows = (target_bytes // max(1, B * D * itemsize)) // 8 * 8
    rows = max(8, rows)
    return int(max(1, min(S, rows)))


def positional_encoding_forward(x, pe, *, p=0.1, training=False, rng_key=None,
                                block_s=None):
    """x: (S, B, D) float array; pe: (max_len, 1, D) buffer."""
    S, B, D = x.shape
    max_len = pe.shape[0]
    assert S <= max_len, "sequence length exceeds positional-encoding table"

    # One-time dtype alignment (build pe in the model dtype to make this a no-op).
    if pe.dtype != x.dtype:
        pe = pe.astype(x.dtype)

    if block_s is None:
        block_s = _default_block_s(S, B, D, x.dtype.itemsize)
    grid = (pl.cdiv(S, block_s),)

    # Last two block dims equal the full array dims (B, D), so the (8,128)
    # tiling constraint is satisfied even for small B/D.
    # TODO(synk): for B < 8 with D a multiple of 128, a lane-dense (S, B*D)
    # layout would give full-rate (unmasked) output stores.
    x_spec = pl.BlockSpec((block_s, B, D), lambda i: (i, 0, 0))
    pe_spec = pl.BlockSpec((block_s, 1, D), lambda i: (i, 0, 0))   # full pe, no slice
    out_spec = pl.BlockSpec((block_s, B, D), lambda i: (i, 0, 0))
    out_shape = jax.ShapeDtypeStruct(x.shape, x.dtype)
    cparams = pltpu.CompilerParams(dimension_semantics=("parallel",))

    if not training or p == 0.0:
        # Dropout is the identity in eval mode — exact torch semantics.
        return pl.pallas_call(
            _pe_eval_kernel,
            out_shape=out_shape,
            grid_spec=pltpu.PrefetchScalarGridSpec(
                num_scalar_prefetch=0,
                grid=grid,
                in_specs=[x_spec, pe_spec],
                out_specs=out_spec,
            ),
            compiler_params=cparams,
        )(x, pe)

    # TODO(synk): torch's RNG stream cannot be reproduced bit-exactly; only the
    # dropout distribution (keep prob 1-p, scale 1/(1-p)) is matched. The caller
    # should pass a fresh rng_key every training step.
    if rng_key is None:
        rng_key = jax.random.PRNGKey(0)
    bits = jax.random.bits(rng_key, x.shape, dtype=jnp.uint32)
    threshold = min(int(round(p * (1 << 32))), (1 << 32) - 1)
    scale = 1.0 / (1.0 - p)
    bits_spec = pl.BlockSpec((block_s, B, D), lambda i: (i, 0, 0))

    return pl.pallas_call(
        functools.partial(_pe_train_kernel, threshold=threshold, scale=scale),
        out_shape=out_shape,
        grid_spec=pltpu.PrefetchScalarGridSpec(
            num_scalar_prefetch=0,
            grid=grid,
            in_specs=[x_spec, pe_spec, bits_spec],
            out_specs=out_spec,
        ),
        compiler_params=cparams,
    )(x, pe, bits)


if __name__ == "__main__":
    # Small shapes consistent with the module: seq=8, batch=2, d_model=32.
    S, B, D = 8, 2, 32
    key = jax.random.PRNGKey(0)
    x = jax.random.normal(key, (S, B, D), dtype=jnp.float32)

    pe = make_positional_encoding(d_model=D, max_len=64, dtype=x.dtype)

    # Eval-mode forward (dropout is identity) — exact reference check.
    out = positional_encoding_forward(x, pe, training=False)
    out = jax.block_until_ready(out)
    ref = x + pe[:S]
    assert out.shape == x.shape and out.dtype == x.dtype
    assert jnp.allclose(out, ref, atol=1e-6, rtol=1e-6)

    # Training-mode forward (fused add + inverted dropout, p=0.1).
    p = 0.1
    out_train = positional_encoding_forward(
        x, pe, p=p, training=True, rng_key=jax.random.PRNGKey(1234))
    out_train = jax.block_until_ready(out_train)
    assert out_train.shape == x.shape and out_train.dtype == x.dtype
    # Every surviving element must equal (x + pe) / (1 - p); dropped ones are 0.
    kept = out_train != 0.0
    assert jnp.allclose(jnp.where(kept, out_train, 0.0),
                        jnp.where(kept, ref / (1.0 - p), 0.0),
                        atol=1e-5, rtol=1e-5)

    print("KERNEL_OK")
</pallas_src>

<mosaic_0001>
module attributes {stable_mosaic.version = 11 : i64} {
  func.func @_pe_eval_kernel(%arg0: i32, %arg1: memref<8x2x32xf32, #tpu.memory_space<vmem>>, %arg2: memref<8x1x32xf32, #tpu.memory_space<vmem>>, %arg3: memref<8x2x32xf32, #tpu.memory_space<vmem>>) attributes {dimension_semantics = [#tpu.dimension_semantics<parallel>], iteration_bounds = array<i64: 1>, scalar_prefetch = 0 : i64, scratch_operands = 0 : i64, tpu.core_type = #tpu.core_type<tc>, window_params = [{transform_indices = @transform_0, window_bounds = array<i64: 8, 2, 32>}, {transform_indices = @transform_1, window_bounds = array<i64: 8, 1, 32>}, {transform_indices = @transform_2, window_bounds = array<i64: 8, 2, 32>}]} {
    %c0 = arith.constant 0 : index
    %c0_0 = arith.constant 0 : index
    %c0_1 = arith.constant 0 : index
    %0 = vector.load %arg1[%c0, %c0_0, %c0_1] : memref<8x2x32xf32, #tpu.memory_space<vmem>>, vector<8x2x32xf32>
    %c0_2 = arith.constant 0 : index
    %c0_3 = arith.constant 0 : index
    %c0_4 = arith.constant 0 : index
    %1 = vector.load %arg2[%c0_2, %c0_3, %c0_4] : memref<8x1x32xf32, #tpu.memory_space<vmem>>, vector<8x1x32xf32>
    %2 = vector.broadcast %1 : vector<8x1x32xf32> to vector<8x2x32xf32>
    %3 = arith.addf %0, %2 : vector<8x2x32xf32>
    %c0_5 = arith.constant 0 : index
    %c0_6 = arith.constant 0 : index
    %c0_7 = arith.constant 0 : index
    %4 = vector.load %arg3[%c0_5, %c0_6, %c0_7] : memref<8x2x32xf32, #tpu.memory_space<vmem>>, vector<8x2x32xf32>
    tpu.vector_store %arg3[%c0_5, %c0_6, %c0_7], %3 {strides = array<i32>} : memref<8x2x32xf32, #tpu.memory_space<vmem>>, vector<8x2x32xf32>,
    return
  }
  func.func @transform_0(%arg0: i32) -> (i32, i32, i32) {
    %c0_i32 = arith.constant 0 : i32
    %c0_i32_0 = arith.constant 0 : i32
    %c0_i32_1 = arith.constant 0 : i32
    return %arg0, %c0_i32, %c0_i32_0 : i32, i32, i32
  }
  func.func @transform_1(%arg0: i32) -> (i32, i32, i32) {
    %c0_i32 = arith.constant 0 : i32
    %c0_i32_0 = arith.constant 0 : i32
    %c0_i32_1 = arith.constant 0 : i32
    return %arg0, %c0_i32, %c0_i32_0 : i32, i32, i32
  }
  func.func @transform_2(%arg0: i32) -> (i32, i32, i32) {
    %c0_i32 = arith.constant 0 : i32
    %c0_i32_0 = arith.constant 0 : i32
    %c0_i32_1 = arith.constant 0 : i32
    return %arg0, %c0_i32, %c0_i32_0 : i32, i32, i32
  }
}

</mosaic_0001>

<bundles_post_ra>
// kernel: tpu_custom_call.1
= control target key start
LH: loop header
LB: loop body
LE: loop exit
PB: predicated region body
PF: predicated region fallthrough
CT: control target
= control target key end

     0   :  { %vm84_vm0 = vcmask 254976   ;;  %s219_s0 = inlined_call_operand.vmem [shape: f32[8,2,32], index: 0, kind: input, shape index: {}]   ;;  %s220_s1 = inlined_call_operand.vmem [shape: f32[64,1,32], index: 1, kind: input, shape index: {}]   ;;  %s221_s2 = inlined_call_operand.hbm [shape: f32[8,2,32], index: 2, kind: output, shape index: {}]  }
   0x1   :  { %v12_v0 = vld [vmem:[%s219_s0] sm:$0x3]  ;;  %v13_v3 = vld [vmem:[%s219_s0 + $0x2] sm:$0x3]  ;;  %v14_v5 = vld [vmem:[%s219_s0 + $0x4] sm:$0x3] }
   0x2   :  { %v109_v1 = vld [vmem:[%s220_s1] ss:$0 sm:$0xff]  ;;  %v110_v4 = vld [vmem:[%s220_s1 + $0x1] ss:$0 sm:$0xff]  ;;  %v111_v7 = vld [vmem:[%s220_s1 + $0x2] ss:$0 sm:$0xff] }
   0x3   :  { %v76_v2 = vadd.f32 %v109_v1, %v12_v0  ;;  %v77_v6 = vadd.f32 %v110_v4, %v13_v3  ;;  %v15_v8 = vld [vmem:[%s219_s0 + $0x6] sm:$0x3]  ;;  %v112_v9 = vld [vmem:[%s220_s1 + $0x3] ss:$0 sm:$0xff]  ;;  %v78_v10 = vadd.f32 %v111_v7, %v14_v5  ;;  %v16_v12 = vld [vmem:[%s219_s0 + $0x8] sm:$0x3] }
   0x4   :  { %v79_v11 = vadd.f32 %v112_v9, %v15_v8  ;;  %v113_v13 = vld [vmem:[%s220_s1 + $0x4] ss:$0 sm:$0xff]  ;;  %v17_v14 = vld [vmem:[%s219_s0 + $0xa] sm:$0x3]  ;;  %v114_v16 = vld [vmem:[%s220_s1 + $0x5] ss:$0 sm:$0xff] }
   0x5   :  { %85 = vst.msk [vmem:[#allocation2] sm:$0x3] %vm84_vm0, %v76_v2  ;;  %86 = vst.msk [vmem:[#allocation2 + $0x2] sm:$0x3] %vm84_vm0, %v77_v6  ;;  %v80_v15 = vadd.f32 %v113_v13, %v16_v12  ;;  %v18_v17 = vld [vmem:[%s219_s0 + $0xc] sm:$0x3]  ;;  %v81_v19 = vadd.f32 %v114_v16, %v17_v14 }
   0x6   :  { %v115_v18 = vld [vmem:[%s220_s1 + $0x6] ss:$0 sm:$0xff]  ;;  %87 = vst.msk [vmem:[#allocation2 + $0x4] sm:$0x3] %vm84_vm0, %v78_v10  ;;  %88 = vst.msk [vmem:[#allocation2 + $0x6] sm:$0x3] %vm84_vm0, %v79_v11 }
   0x7   :  { %v82_v20 = vadd.f32 %v115_v18, %v18_v17  ;;  %v19_v21 = vld [vmem:[%s219_s0 + $0xe] sm:$0x3]  ;;  %v116_v22 = vld [vmem:[%s220_s1 + $0x7] ss:$0 sm:$0xff] }
   0x8   :  { %7 = vsyncpa [#allocation3], 0  ;;  %89 = vst.msk [vmem:[#allocation2 + $0x8] sm:$0x3] %vm84_vm0, %v80_v15  ;;  %v83_v23 = vadd.f32 %v116_v22, %v19_v21  ;;  %s142_s13 = smov [#allocation2]  }
   0x9   :  { %s98_s14 = sshll.u32 %s142_s13, 4  ;;  %90 = vst.msk [vmem:[#allocation2 + $0xa] sm:$0x3] %vm84_vm0, %v81_v19  ;;  %91 = vst.msk [vmem:[#allocation2 + $0xc] sm:$0x3] %vm84_vm0, %v82_v20  ;;  %s99_s14 = int_to_ptr.vmem [resolvable:$true] %s98_s14 }
   0xa   :  { %92 = vst.msk [vmem:[#allocation2 + $0xe] sm:$0x3] %vm84_vm0, %v83_v23  ;;  %s120_s15 = scalar_lea.vmem %s99_s14, 256  ;;  %p125_p1 = scmp.lt.s32.totalorder %s99_s14, %s99_s14 }
   0xb   :  { %p121_p0 = scmp.ne.s32.totalorder %s99_s14, %s120_s15  ;;  %p126_p2 = scmp.lt.s32.totalorder %s120_s15, %s120_s15 }
   0xd   :  { %p127_p3 = por %p126_p2, %p125_p1 }
   0xf   :  { %p128_p4 = pnand %p127_p3, %p121_p0 }
  0x11   :  { %131 = shalt.err (!%p128_p4)
}
  0x12   :  { %s143_s0 = smov 32   ;;  %s144_s1 = smov 2  }
  0x13   :  { %104 = dma.vmem_to_hbm [thread:$0]  %s99_s14, 256, %s221_s2, [#allocation3], %s143_s0, %s143_s0, %s144_s1  }
  0x14   :  { %140 = dma.done.wait [#allocation3], 256  }
  0x15   :  { %141 = vsyncadd [#allocation3], 4294967040 }
  0x16   :  { %108 = vsyncpa [#allocation3], 1 }

</bundles_post_ra>
